<compile_context>
chip_gen: v6e
topology: v6e:2x2x1
jax: 0.10.0
libtpu: 0.0.40
codegen_flags: <defaults>
</compile_context>

<pallas_src>
import functools

import jax
import jax.numpy as jnp
from jax.experimental import pallas as pl
from jax.experimental.pallas import tpu as pltpu


def _make_res2net_kernel(B, T, cin, hid, K, dilation, pad, scale, eps,
                         mxu_dtype):
    """Fused kernel: whole Res2Net chain on lane-dense (channels, B*T) slabs."""
    BT = B * T
    inv_n = 1.0 / float(BT)

    def build_patches(inp):
        # inp: (cin, B*T) f32 value.  Returns the im2col patch matrix
        # (K*cin, B*T) for a 'same'-padded (reflect) dilated conv:
        #   patches[k*cin + c, b*T + t] = reflect_pad(inp)[c, b, t + k*dilation]
        # Built from static slices + concatenation only (K, B, pad are small
        # static ints; loops unroll at trace time).
        row_blocks = []
        for k in range(K):
            s = k * dilation - pad                     # tap shift in [-pad, pad]
            cols = []
            for b in range(B):
                c0 = b * T
                segs = []
                if s < 0:
                    # reflected head: t in [0, -s)  <-  inp[:, -s - t]
                    for t in range(-s):
                        src = c0 + (-s - t)
                        segs.append(inp[:, src:src + 1])
                    segs.append(inp[:, c0:c0 + T + s])          # main window
                else:
                    segs.append(inp[:, c0 + s:c0 + T])          # main window
                    # reflected tail: t in [T-s, T)  <-  inp[:, 2T-2-t-s]
                    for t in range(T - s, T):
                        src = c0 + (2 * T - 2 - t - s)
                        segs.append(inp[:, src:src + 1])
                cols.append(segs[0] if len(segs) == 1
                            else jnp.concatenate(segs, axis=-1))
            row_blocks.append(cols[0] if B == 1
                              else jnp.concatenate(cols, axis=-1))
        return jnp.concatenate(row_blocks, axis=0)              # (K*cin, B*T)

    def kernel(x_ref, w_ref, b_ref, g_ref, be_ref, o_ref):
        x = x_ref[...]                                          # (C, B*T)

        # Chunk 0: identity passthrough written straight into the fused
        # (already concatenated) output -- no wrapper-side concat / copy.
        o_ref[0:cin, :] = x[0:cin, :].astype(o_ref.dtype)

        y_prev = None
        for i in range(1, scale):                               # serial chain
            xi = x[i * cin:(i + 1) * cin, :].astype(jnp.float32)
            inp = xi if i == 1 else xi + y_prev

            # Conv1d(same, reflect, dilation) as ONE MXU matmul over im2col.
            patches = build_patches(inp)                        # (K*cin, B*T)
            w = w_ref[i - 1]                                    # (hid, K*cin)
            a = jnp.dot(w.astype(mxu_dtype), patches.astype(mxu_dtype),
                        preferred_element_type=jnp.float32)     # (hid, B*T)
            a = jnp.maximum(a + b_ref[i - 1], 0.0)              # bias + ReLU

            # BatchNorm1d training-mode forward: biased stats over (B, T)
            # (= the lane axis), folded into one scale/shift FMA.
            mean = jnp.sum(a, axis=-1, keepdims=True) * inv_n   # (hid, 1)
            d = a - mean
            var = jnp.sum(d * d, axis=-1, keepdims=True) * inv_n
            sc = g_ref[i - 1] * jax.lax.rsqrt(var + eps)        # EUP rsqrt
            sh = be_ref[i - 1] - mean * sc
            y_prev = a * sc + sh

            r0 = cin + (i - 1) * hid
            o_ref[r0:r0 + hid, :] = y_prev.astype(o_ref.dtype)

    return kernel


def res2net_block_pallas(x, params, *, scale, dilation, eps=1e-5,
                         mxu_dtype=jnp.float32):
    """Res2NetBlock.forward.  x: (B, C, T) float32 -> (B, C_out, T).

    `params`: list of (scale-1) dicts with w:(hid,cin,K), b/gamma/beta:(hid,).
    Set mxu_dtype=jnp.bfloat16 on v6e/v7x to run the MXU in bf16 (f32 accum);
    elementwise math stays float32 (required on v5e).
    """
    B, C, T = x.shape
    assert C % scale == 0
    cin = C // scale
    hid, w_cin, K = params[0]["w"].shape
    assert w_cin == cin
    if scale > 2:
        assert hid == cin, "residual add x_i + y_{i-1} needs hid == cin"
    pad = dilation * (K - 1) // 2
    assert T > pad, "reflect padding requires T > dilation*(K-1)//2"
    BT = B * T
    nb = scale - 1
    c_out = cin + nb * hid

    # Lane-dense input slab (C, B*T): channels on sublanes, batch*time on
    # lanes (layout plumbing done once, outside the kernel).
    x_t = jnp.transpose(x, (1, 0, 2)).reshape(C, BT)

    # Stack per-block parameters; weights flattened to (hid, K*cin) with
    # column order (k-major, then input channel) to match the patch rows.
    w_all = jnp.stack([jnp.transpose(p["w"], (0, 2, 1)).reshape(hid, K * cin)
                       for p in params])                        # (nb, hid, K*cin)
    b_all = jnp.stack([p["b"] for p in params]).reshape(nb, hid, 1)
    g_all = jnp.stack([p["gamma"] for p in params]).reshape(nb, hid, 1)
    be_all = jnp.stack([p["beta"] for p in params]).reshape(nb, hid, 1)

    kernel = _make_res2net_kernel(B, T, cin, hid, K, dilation, pad, scale,
                                  eps, mxu_dtype)

    cost = pl.CostEstimate(
        flops=int(2 * nb * hid * K * cin * BT + 10 * nb * hid * BT),
        transcendentals=int(nb * hid),
        bytes_accessed=int(4 * (C * BT + nb * hid * K * cin + 3 * nb * hid
                                + c_out * BT)),
    )

    out2d = pl.pallas_call(
        kernel,
        out_shape=jax.ShapeDtypeStruct((c_out, BT), x.dtype),
        grid=(1,),
        in_specs=[
            pl.BlockSpec((C, BT), lambda i: (0, 0)),
            pl.BlockSpec((nb, hid, K * cin), lambda i: (0, 0, 0)),
            pl.BlockSpec((nb, hid, 1), lambda i: (0, 0, 0)),
            pl.BlockSpec((nb, hid, 1), lambda i: (0, 0, 0)),
            pl.BlockSpec((nb, hid, 1), lambda i: (0, 0, 0)),
        ],
        out_specs=pl.BlockSpec((c_out, BT), lambda i: (0, 0)),
        compiler_params=pltpu.CompilerParams(
            dimension_semantics=("arbitrary",),
            vmem_limit_bytes=32 * 1024 * 1024,
        ),
        cost_estimate=cost,
    )(x_t, w_all, b_all, g_all, be_all)

    # Back to the module's (B, C_out, T) layout.
    return jnp.transpose(out2d.reshape(c_out, B, T), (1, 0, 2))


# ---------------- pure-JAX reference (for correctness check) ----------------

def _tdnn_block_ref(x, w, b, g, beta, dilation, eps=1e-5):
    K = w.shape[-1]
    pad = dilation * (K - 1) // 2
    xp = jnp.pad(x, ((0, 0), (0, 0), (pad, pad)), mode="reflect")
    y = jax.lax.conv_general_dilated(
        xp, w, window_strides=(1,), padding="VALID",
        rhs_dilation=(dilation,), dimension_numbers=("NCH", "OIH", "NCH"))
    y = y + b[None, :, None]
    y = jnp.maximum(y, 0.0)
    mean = jnp.mean(y, axis=(0, 2), keepdims=True)
    var = jnp.mean((y - mean) ** 2, axis=(0, 2), keepdims=True)
    return (y - mean) * jax.lax.rsqrt(var + eps) * g[None, :, None] \
        + beta[None, :, None]


def _res2net_ref(x, params, *, scale, dilation):
    C = x.shape[1]
    chunk = C // scale
    xs = [x[:, i * chunk:(i + 1) * chunk, :] for i in range(scale)]
    ys = [xs[0]]
    y_prev = None
    for i in range(1, scale):
        inp = xs[i] if i == 1 else xs[i] + y_prev
        p = params[i - 1]
        y_prev = _tdnn_block_ref(inp, p["w"], p["b"], p["gamma"], p["beta"],
                                 dilation)
        ys.append(y_prev)
    return jnp.concatenate(ys, axis=1)


# ---------------------------- parameter init --------------------------------

def init_params(key, in_channels, out_channels, scale, kernel_size):
    in_ch = in_channels // scale
    hid = out_channels // scale
    params = []
    for _ in range(scale - 1):
        key, k1, k2 = jax.random.split(key, 3)
        params.append(dict(
            w=jax.random.normal(k1, (hid, in_ch, kernel_size), jnp.float32) * 0.1,
            b=jax.random.normal(k2, (hid,), jnp.float32) * 0.1,
            gamma=jnp.ones((hid,), jnp.float32),   # PyTorch BN default init
            beta=jnp.zeros((hid,), jnp.float32),
        ))
    return params


if __name__ == "__main__":
    B, C, T = 2, 32, 16
    scale, kernel_size, dilation = 4, 3, 3

    key = jax.random.PRNGKey(0)
    kx, kp = jax.random.split(key)
    x = jax.random.normal(kx, (B, C, T), jnp.float32)
    params = init_params(kp, C, C, scale, kernel_size)

    run = jax.jit(functools.partial(res2net_block_pallas, scale=scale,
                                    dilation=dilation))
    out = jax.block_until_ready(run(x, params))

    ref = _res2net_ref(x, params, scale=scale, dilation=dilation)
    assert out.shape == (B, C, T), out.shape
    err = float(jnp.max(jnp.abs(out - ref)))
    assert jnp.allclose(out, ref, atol=1e-4, rtol=1e-4), err

    print("KERNEL_OK")
</pallas_src>

<mosaic_0001>
module attributes {stable_mosaic.version = 11 : i64} {
  func.func @kernel(%arg0: i32, %arg1: memref<32x32xf32, #tpu.memory_space<vmem>>, %arg2: memref<3x8x24xf32, #tpu.memory_space<vmem>>, %arg3: memref<3x8x1xf32, #tpu.memory_space<vmem>>, %arg4: memref<3x8x1xf32, #tpu.memory_space<vmem>>, %arg5: memref<3x8x1xf32, #tpu.memory_space<vmem>>, %arg6: memref<32x32xf32, #tpu.memory_space<vmem>>) attributes {dimension_semantics = [#tpu.dimension_semantics<arbitrary>], iteration_bounds = array<i64: 1>, scalar_prefetch = 0 : i64, scratch_operands = 0 : i64, tpu.core_type = #tpu.core_type<tc>, window_params = [{pipeline_mode = #tpu.pipeline_mode<synchronous>, transform_indices = @transform_0, window_bounds = array<i64: 32, 32>}, {pipeline_mode = #tpu.pipeline_mode<synchronous>, transform_indices = @transform_1, window_bounds = array<i64: 3, 8, 24>}, {pipeline_mode = #tpu.pipeline_mode<synchronous>, transform_indices = @transform_2, window_bounds = array<i64: 3, 8, 1>}, {pipeline_mode = #tpu.pipeline_mode<synchronous>, transform_indices = @transform_3, window_bounds = array<i64: 3, 8, 1>}, {pipeline_mode = #tpu.pipeline_mode<synchronous>, transform_indices = @transform_4, window_bounds = array<i64: 3, 8, 1>}, {pipeline_mode = #tpu.pipeline_mode<synchronous>, transform_indices = @transform_5, window_bounds = array<i64: 32, 32>}]} {
    %c0 = arith.constant 0 : index
    %c0_0 = arith.constant 0 : index
    %0 = vector.load %arg1[%c0, %c0_0] : memref<32x32xf32, #tpu.memory_space<vmem>>, vector<32x32xf32>
    %1 = vector.extract_strided_slice %0 {offsets = [0, 0], sizes = [8, 32], strides = [1, 1]} : vector<32x32xf32> to vector<8x32xf32>
    %c0_1 = arith.constant 0 : index
    %c0_2 = arith.constant 0 : index
    %2 = vector.load %arg6[%c0_1, %c0_2] : memref<32x32xf32, #tpu.memory_space<vmem>>, vector<8x32xf32>
    tpu.vector_store %arg6[%c0_1, %c0_2], %1 {strides = array<i32>} : memref<32x32xf32, #tpu.memory_space<vmem>>, vector<8x32xf32>,
    %3 = vector.extract_strided_slice %0 {offsets = [8, 0], sizes = [8, 32], strides = [1, 1]} : vector<32x32xf32> to vector<8x32xf32>
    %4 = vector.extract_strided_slice %3 {offsets = [0, 3], sizes = [8, 1], strides = [1, 1]} : vector<8x32xf32> to vector<8x1xf32>
    %5 = vector.extract_strided_slice %3 {offsets = [0, 2], sizes = [8, 1], strides = [1, 1]} : vector<8x32xf32> to vector<8x1xf32>
    %6 = vector.extract_strided_slice %3 {offsets = [0, 1], sizes = [8, 1], strides = [1, 1]} : vector<8x32xf32> to vector<8x1xf32>
    %7 = vector.extract_strided_slice %3 {offsets = [0, 0], sizes = [8, 13], strides = [1, 1]} : vector<8x32xf32> to vector<8x13xf32>
    %8 = tpu.concatenate %4, %5, %6, %7 in 1 : vector<8x1xf32>, vector<8x1xf32>, vector<8x1xf32>, vector<8x13xf32> -> vector<8x16xf32>
    %9 = vector.extract_strided_slice %3 {offsets = [0, 19], sizes = [8, 1], strides = [1, 1]} : vector<8x32xf32> to vector<8x1xf32>
    %10 = vector.extract_strided_slice %3 {offsets = [0, 18], sizes = [8, 1], strides = [1, 1]} : vector<8x32xf32> to vector<8x1xf32>
    %11 = vector.extract_strided_slice %3 {offsets = [0, 17], sizes = [8, 1], strides = [1, 1]} : vector<8x32xf32> to vector<8x1xf32>
    %12 = vector.extract_strided_slice %3 {offsets = [0, 16], sizes = [8, 13], strides = [1, 1]} : vector<8x32xf32> to vector<8x13xf32>
    %13 = tpu.concatenate %9, %10, %11, %12 in 1 : vector<8x1xf32>, vector<8x1xf32>, vector<8x1xf32>, vector<8x13xf32> -> vector<8x16xf32>
    %14 = tpu.concatenate %8, %13 in 1 : vector<8x16xf32>, vector<8x16xf32> -> vector<8x32xf32>
    %15 = vector.extract_strided_slice %3 {offsets = [0, 0], sizes = [8, 16], strides = [1, 1]} : vector<8x32xf32> to vector<8x16xf32>
    %16 = vector.extract_strided_slice %3 {offsets = [0, 16], sizes = [8, 16], strides = [1, 1]} : vector<8x32xf32> to vector<8x16xf32>
    %17 = tpu.concatenate %15, %16 in 1 : vector<8x16xf32>, vector<8x16xf32> -> vector<8x32xf32>
    %18 = vector.extract_strided_slice %3 {offsets = [0, 3], sizes = [8, 13], strides = [1, 1]} : vector<8x32xf32> to vector<8x13xf32>
    %19 = vector.extract_strided_slice %3 {offsets = [0, 14], sizes = [8, 1], strides = [1, 1]} : vector<8x32xf32> to vector<8x1xf32>
    %20 = vector.extract_strided_slice %3 {offsets = [0, 13], sizes = [8, 1], strides = [1, 1]} : vector<8x32xf32> to vector<8x1xf32>
    %21 = vector.extract_strided_slice %3 {offsets = [0, 12], sizes = [8, 1], strides = [1, 1]} : vector<8x32xf32> to vector<8x1xf32>
    %22 = tpu.concatenate %18, %19, %20, %21 in 1 : vector<8x13xf32>, vector<8x1xf32>, vector<8x1xf32>, vector<8x1xf32> -> vector<8x16xf32>
    %23 = vector.extract_strided_slice %3 {offsets = [0, 19], sizes = [8, 13], strides = [1, 1]} : vector<8x32xf32> to vector<8x13xf32>
    %24 = vector.extract_strided_slice %3 {offsets = [0, 30], sizes = [8, 1], strides = [1, 1]} : vector<8x32xf32> to vector<8x1xf32>
    %25 = vector.extract_strided_slice %3 {offsets = [0, 29], sizes = [8, 1], strides = [1, 1]} : vector<8x32xf32> to vector<8x1xf32>
    %26 = vector.extract_strided_slice %3 {offsets = [0, 28], sizes = [8, 1], strides = [1, 1]} : vector<8x32xf32> to vector<8x1xf32>
    %27 = tpu.concatenate %23, %24, %25, %26 in 1 : vector<8x13xf32>, vector<8x1xf32>, vector<8x1xf32>, vector<8x1xf32> -> vector<8x16xf32>
    %28 = tpu.concatenate %22, %27 in 1 : vector<8x16xf32>, vector<8x16xf32> -> vector<8x32xf32>
    %29 = tpu.concatenate %14, %17, %28 in 0 : vector<8x32xf32>, vector<8x32xf32>, vector<8x32xf32> -> vector<24x32xf32>
    %c0_3 = arith.constant 0 : index
    %c0_4 = arith.constant 0 : index
    %c0_5 = arith.constant 0 : index
    %30 = vector.load %arg2[%c0_3, %c0_4, %c0_5] : memref<3x8x24xf32, #tpu.memory_space<vmem>>, vector<1x8x24xf32>
    %31 = vector.shape_cast %30 : vector<1x8x24xf32> to vector<8x24xf32>
    %cst = arith.constant dense<0.000000e+00> : vector<8x32xf32>
    %32 = tpu.matmul %31, %29, %cst {dimension_numbers = #tpu.dot_dimension_numbers<[1], [0], [0], [1], [0, 0, 1, 1], [], []>} : vector<8x24xf32>, vector<24x32xf32>, vector<8x32xf32> -> vector<8x32xf32>
    %c0_6 = arith.constant 0 : index
    %c0_7 = arith.constant 0 : index
    %c0_8 = arith.constant 0 : index
    %33 = vector.load %arg3[%c0_6, %c0_7, %c0_8] : memref<3x8x1xf32, #tpu.memory_space<vmem>>, vector<1x8x1xf32>
    %34 = vector.shape_cast %33 : vector<1x8x1xf32> to vector<8x1xf32>
    %35 = vector.broadcast %34 : vector<8x1xf32> to vector<8x32xf32>
    %36 = arith.addf %32, %35 : vector<8x32xf32>
    %cst_9 = arith.constant 0.000000e+00 : f32
    %37 = vector.broadcast %cst_9 : f32 to vector<8x32xf32>
    %38 = arith.maximumf %36, %37 : vector<8x32xf32>
    %cst_10 = arith.constant dense<0.000000e+00> : vector<8xf32>
    %39 = vector.multi_reduction <add>, %38, %cst_10 [1] : vector<8x32xf32> to vector<8xf32>
    %40 = vector.shape_cast %39 : vector<8xf32> to vector<8x1xf32>
    %cst_11 = arith.constant 3.125000e-02 : f32
    %41 = vector.broadcast %cst_11 : f32 to vector<8x1xf32>
    %42 = arith.mulf %40, %41 : vector<8x1xf32>
    %43 = vector.broadcast %42 : vector<8x1xf32> to vector<8x32xf32>
    %44 = arith.subf %38, %43 : vector<8x32xf32>
    %45 = arith.mulf %44, %44 : vector<8x32xf32>
    %cst_12 = arith.constant dense<0.000000e+00> : vector<8xf32>
    %46 = vector.multi_reduction <add>, %45, %cst_12 [1] : vector<8x32xf32> to vector<8xf32>
    %47 = vector.shape_cast %46 : vector<8xf32> to vector<8x1xf32>
    %cst_13 = arith.constant 3.125000e-02 : f32
    %48 = vector.broadcast %cst_13 : f32 to vector<8x1xf32>
    %49 = arith.mulf %47, %48 : vector<8x1xf32>
    %c0_14 = arith.constant 0 : index
    %c0_15 = arith.constant 0 : index
    %c0_16 = arith.constant 0 : index
    %50 = vector.load %arg4[%c0_14, %c0_15, %c0_16] : memref<3x8x1xf32, #tpu.memory_space<vmem>>, vector<1x8x1xf32>
    %51 = vector.shape_cast %50 : vector<1x8x1xf32> to vector<8x1xf32>
    %cst_17 = arith.constant 9.99999974E-6 : f32
    %52 = vector.broadcast %cst_17 : f32 to vector<8x1xf32>
    %53 = arith.addf %49, %52 : vector<8x1xf32>
    %54 = math.rsqrt %53 : vector<8x1xf32>
    %55 = arith.mulf %51, %54 : vector<8x1xf32>
    %c0_18 = arith.constant 0 : index
    %c0_19 = arith.constant 0 : index
    %c0_20 = arith.constant 0 : index
    %56 = vector.load %arg5[%c0_18, %c0_19, %c0_20] : memref<3x8x1xf32, #tpu.memory_space<vmem>>, vector<1x8x1xf32>
    %57 = vector.shape_cast %56 : vector<1x8x1xf32> to vector<8x1xf32>
    %58 = arith.mulf %42, %55 : vector<8x1xf32>
    %59 = arith.subf %57, %58 : vector<8x1xf32>
    %60 = vector.broadcast %55 : vector<8x1xf32> to vector<8x32xf32>
    %61 = arith.mulf %38, %60 : vector<8x32xf32>
    %62 = vector.broadcast %59 : vector<8x1xf32> to vector<8x32xf32>
    %63 = arith.addf %61, %62 : vector<8x32xf32>
    %c8 = arith.constant 8 : index
    %c0_21 = arith.constant 0 : index
    %64 = vector.load %arg6[%c8, %c0_21] : memref<32x32xf32, #tpu.memory_space<vmem>>, vector<8x32xf32>
    tpu.vector_store %arg6[%c8, %c0_21], %63 {strides = array<i32>} : memref<32x32xf32, #tpu.memory_space<vmem>>, vector<8x32xf32>,
    %65 = vector.extract_strided_slice %0 {offsets = [16, 0], sizes = [8, 32], strides = [1, 1]} : vector<32x32xf32> to vector<8x32xf32>
    %66 = arith.addf %65, %63 : vector<8x32xf32>
    %67 = vector.extract_strided_slice %66 {offsets = [0, 3], sizes = [8, 1], strides = [1, 1]} : vector<8x32xf32> to vector<8x1xf32>
    %68 = vector.extract_strided_slice %66 {offsets = [0, 2], sizes = [8, 1], strides = [1, 1]} : vector<8x32xf32> to vector<8x1xf32>
    %69 = vector.extract_strided_slice %66 {offsets = [0, 1], sizes = [8, 1], strides = [1, 1]} : vector<8x32xf32> to vector<8x1xf32>
    %70 = vector.extract_strided_slice %66 {offsets = [0, 0], sizes = [8, 13], strides = [1, 1]} : vector<8x32xf32> to vector<8x13xf32>
    %71 = tpu.concatenate %67, %68, %69, %70 in 1 : vector<8x1xf32>, vector<8x1xf32>, vector<8x1xf32>, vector<8x13xf32> -> vector<8x16xf32>
    %72 = vector.extract_strided_slice %66 {offsets = [0, 19], sizes = [8, 1], strides = [1, 1]} : vector<8x32xf32> to vector<8x1xf32>
    %73 = vector.extract_strided_slice %66 {offsets = [0, 18], sizes = [8, 1], strides = [1, 1]} : vector<8x32xf32> to vector<8x1xf32>
    %74 = vector.extract_strided_slice %66 {offsets = [0, 17], sizes = [8, 1], strides = [1, 1]} : vector<8x32xf32> to vector<8x1xf32>
    %75 = vector.extract_strided_slice %66 {offsets = [0, 16], sizes = [8, 13], strides = [1, 1]} : vector<8x32xf32> to vector<8x13xf32>
    %76 = tpu.concatenate %72, %73, %74, %75 in 1 : vector<8x1xf32>, vector<8x1xf32>, vector<8x1xf32>, vector<8x13xf32> -> vector<8x16xf32>
    %77 = tpu.concatenate %71, %76 in 1 : vector<8x16xf32>, vector<8x16xf32> -> vector<8x32xf32>
    %78 = vector.extract_strided_slice %66 {offsets = [0, 0], sizes = [8, 16], strides = [1, 1]} : vector<8x32xf32> to vector<8x16xf32>
    %79 = vector.extract_strided_slice %66 {offsets = [0, 16], sizes = [8, 16], strides = [1, 1]} : vector<8x32xf32> to vector<8x16xf32>
    %80 = tpu.concatenate %78, %79 in 1 : vector<8x16xf32>, vector<8x16xf32> -> vector<8x32xf32>
    %81 = vector.extract_strided_slice %66 {offsets = [0, 3], sizes = [8, 13], strides = [1, 1]} : vector<8x32xf32> to vector<8x13xf32>
    %82 = vector.extract_strided_slice %66 {offsets = [0, 14], sizes = [8, 1], strides = [1, 1]} : vector<8x32xf32> to vector<8x1xf32>
    %83 = vector.extract_strided_slice %66 {offsets = [0, 13], sizes = [8, 1], strides = [1, 1]} : vector<8x32xf32> to vector<8x1xf32>
    %84 = vector.extract_strided_slice %66 {offsets = [0, 12], sizes = [8, 1], strides = [1, 1]} : vector<8x32xf32> to vector<8x1xf32>
    %85 = tpu.concatenate %81, %82, %83, %84 in 1 : vector<8x13xf32>, vector<8x1xf32>, vector<8x1xf32>, vector<8x1xf32> -> vector<8x16xf32>
    %86 = vector.extract_strided_slice %66 {offsets = [0, 19], sizes = [8, 13], strides = [1, 1]} : vector<8x32xf32> to vector<8x13xf32>
    %87 = vector.extract_strided_slice %66 {offsets = [0, 30], sizes = [8, 1], strides = [1, 1]} : vector<8x32xf32> to vector<8x1xf32>
    %88 = vector.extract_strided_slice %66 {offsets = [0, 29], sizes = [8, 1], strides = [1, 1]} : vector<8x32xf32> to vector<8x1xf32>
    %89 = vector.extract_strided_slice %66 {offsets = [0, 28], sizes = [8, 1], strides = [1, 1]} : vector<8x32xf32> to vector<8x1xf32>
    %90 = tpu.concatenate %86, %87, %88, %89 in 1 : vector<8x13xf32>, vector<8x1xf32>, vector<8x1xf32>, vector<8x1xf32> -> vector<8x16xf32>
    %91 = tpu.concatenate %85, %90 in 1 : vector<8x16xf32>, vector<8x16xf32> -> vector<8x32xf32>
    %92 = tpu.concatenate %77, %80, %91 in 0 : vector<8x32xf32>, vector<8x32xf32>, vector<8x32xf32> -> vector<24x32xf32>
    %c1 = arith.constant 1 : index
    %c0_22 = arith.constant 0 : index
    %c0_23 = arith.constant 0 : index
    %93 = vector.load %arg2[%c1, %c0_22, %c0_23] : memref<3x8x24xf32, #tpu.memory_space<vmem>>, vector<1x8x24xf32>
    %94 = vector.shape_cast %93 : vector<1x8x24xf32> to vector<8x24xf32>
    %cst_24 = arith.constant dense<0.000000e+00> : vector<8x32xf32>
    %95 = tpu.matmul %94, %92, %cst_24 {dimension_numbers = #tpu.dot_dimension_numbers<[1], [0], [0], [1], [0, 0, 1, 1], [], []>} : vector<8x24xf32>, vector<24x32xf32>, vector<8x32xf32> -> vector<8x32xf32>
    %c1_25 = arith.constant 1 : index
    %c0_26 = arith.constant 0 : index
    %c0_27 = arith.constant 0 : index
    %96 = vector.load %arg3[%c1_25, %c0_26, %c0_27] : memref<3x8x1xf32, #tpu.memory_space<vmem>>, vector<1x8x1xf32>
    %97 = vector.shape_cast %96 : vector<1x8x1xf32> to vector<8x1xf32>
    %98 = vector.broadcast %97 : vector<8x1xf32> to vector<8x32xf32>
    %99 = arith.addf %95, %98 : vector<8x32xf32>
    %cst_28 = arith.constant 0.000000e+00 : f32
    %100 = vector.broadcast %cst_28 : f32 to vector<8x32xf32>
    %101 = arith.maximumf %99, %100 : vector<8x32xf32>
    %cst_29 = arith.constant dense<0.000000e+00> : vector<8xf32>
    %102 = vector.multi_reduction <add>, %101, %cst_29 [1] : vector<8x32xf32> to vector<8xf32>
    %103 = vector.shape_cast %102 : vector<8xf32> to vector<8x1xf32>
    %cst_30 = arith.constant 3.125000e-02 : f32
    %104 = vector.broadcast %cst_30 : f32 to vector<8x1xf32>
    %105 = arith.mulf %103, %104 : vector<8x1xf32>
    %106 = vector.broadcast %105 : vector<8x1xf32> to vector<8x32xf32>
    %107 = arith.subf %101, %106 : vector<8x32xf32>
    %108 = arith.mulf %107, %107 : vector<8x32xf32>
    %cst_31 = arith.constant dense<0.000000e+00> : vector<8xf32>
    %109 = vector.multi_reduction <add>, %108, %cst_31 [1] : vector<8x32xf32> to vector<8xf32>
    %110 = vector.shape_cast %109 : vector<8xf32> to vector<8x1xf32>
    %cst_32 = arith.constant 3.125000e-02 : f32
    %111 = vector.broadcast %cst_32 : f32 to vector<8x1xf32>
    %112 = arith.mulf %110, %111 : vector<8x1xf32>
    %c1_33 = arith.constant 1 : index
    %c0_34 = arith.constant 0 : index
    %c0_35 = arith.constant 0 : index
    %113 = vector.load %arg4[%c1_33, %c0_34, %c0_35] : memref<3x8x1xf32, #tpu.memory_space<vmem>>, vector<1x8x1xf32>
    %114 = vector.shape_cast %113 : vector<1x8x1xf32> to vector<8x1xf32>
    %cst_36 = arith.constant 9.99999974E-6 : f32
    %115 = vector.broadcast %cst_36 : f32 to vector<8x1xf32>
    %116 = arith.addf %112, %115 : vector<8x1xf32>
    %117 = math.rsqrt %116 : vector<8x1xf32>
    %118 = arith.mulf %114, %117 : vector<8x1xf32>
    %c1_37 = arith.constant 1 : index
    %c0_38 = arith.constant 0 : index
    %c0_39 = arith.constant 0 : index
    %119 = vector.load %arg5[%c1_37, %c0_38, %c0_39] : memref<3x8x1xf32, #tpu.memory_space<vmem>>, vector<1x8x1xf32>
    %120 = vector.shape_cast %119 : vector<1x8x1xf32> to vector<8x1xf32>
    %121 = arith.mulf %105, %118 : vector<8x1xf32>
    %122 = arith.subf %120, %121 : vector<8x1xf32>
    %123 = vector.broadcast %118 : vector<8x1xf32> to vector<8x32xf32>
    %124 = arith.mulf %101, %123 : vector<8x32xf32>
    %125 = vector.broadcast %122 : vector<8x1xf32> to vector<8x32xf32>
    %126 = arith.addf %124, %125 : vector<8x32xf32>
    %c16 = arith.constant 16 : index
    %c0_40 = arith.constant 0 : index
    %127 = vector.load %arg6[%c16, %c0_40] : memref<32x32xf32, #tpu.memory_space<vmem>>, vector<8x32xf32>
    tpu.vector_store %arg6[%c16, %c0_40], %126 {strides = array<i32>} : memref<32x32xf32, #tpu.memory_space<vmem>>, vector<8x32xf32>,
    %128 = vector.extract_strided_slice %0 {offsets = [24, 0], sizes = [8, 32], strides = [1, 1]} : vector<32x32xf32> to vector<8x32xf32>
    %129 = arith.addf %128, %126 : vector<8x32xf32>
    %130 = vector.extract_strided_slice %129 {offsets = [0, 3], sizes = [8, 1], strides = [1, 1]} : vector<8x32xf32> to vector<8x1xf32>
    %131 = vector.extract_strided_slice %129 {offsets = [0, 2], sizes = [8, 1], strides = [1, 1]} : vector<8x32xf32> to vector<8x1xf32>
    %132 = vector.extract_strided_slice %129 {offsets = [0, 1], sizes = [8, 1], strides = [1, 1]} : vector<8x32xf32> to vector<8x1xf32>
    %133 = vector.extract_strided_slice %129 {offsets = [0, 0], sizes = [8, 13], strides = [1, 1]} : vector<8x32xf32> to vector<8x13xf32>
    %134 = tpu.concatenate %130, %131, %132, %133 in 1 : vector<8x1xf32>, vector<8x1xf32>, vector<8x1xf32>, vector<8x13xf32> -> vector<8x16xf32>
    %135 = vector.extract_strided_slice %129 {offsets = [0, 19], sizes = [8, 1], strides = [1, 1]} : vector<8x32xf32> to vector<8x1xf32>
    %136 = vector.extract_strided_slice %129 {offsets = [0, 18], sizes = [8, 1], strides = [1, 1]} : vector<8x32xf32> to vector<8x1xf32>
    %137 = vector.extract_strided_slice %129 {offsets = [0, 17], sizes = [8, 1], strides = [1, 1]} : vector<8x32xf32> to vector<8x1xf32>
    %138 = vector.extract_strided_slice %129 {offsets = [0, 16], sizes = [8, 13], strides = [1, 1]} : vector<8x32xf32> to vector<8x13xf32>
    %139 = tpu.concatenate %135, %136, %137, %138 in 1 : vector<8x1xf32>, vector<8x1xf32>, vector<8x1xf32>, vector<8x13xf32> -> vector<8x16xf32>
    %140 = tpu.concatenate %134, %139 in 1 : vector<8x16xf32>, vector<8x16xf32> -> vector<8x32xf32>
    %141 = vector.extract_strided_slice %129 {offsets = [0, 0], sizes = [8, 16], strides = [1, 1]} : vector<8x32xf32> to vector<8x16xf32>
    %142 = vector.extract_strided_slice %129 {offsets = [0, 16], sizes = [8, 16], strides = [1, 1]} : vector<8x32xf32> to vector<8x16xf32>
    %143 = tpu.concatenate %141, %142 in 1 : vector<8x16xf32>, vector<8x16xf32> -> vector<8x32xf32>
    %144 = vector.extract_strided_slice %129 {offsets = [0, 3], sizes = [8, 13], strides = [1, 1]} : vector<8x32xf32> to vector<8x13xf32>
    %145 = vector.extract_strided_slice %129 {offsets = [0, 14], sizes = [8, 1], strides = [1, 1]} : vector<8x32xf32> to vector<8x1xf32>
    %146 = vector.extract_strided_slice %129 {offsets = [0, 13], sizes = [8, 1], strides = [1, 1]} : vector<8x32xf32> to vector<8x1xf32>
    %147 = vector.extract_strided_slice %129 {offsets = [0, 12], sizes = [8, 1], strides = [1, 1]} : vector<8x32xf32> to vector<8x1xf32>
    %148 = tpu.concatenate %144, %145, %146, %147 in 1 : vector<8x13xf32>, vector<8x1xf32>, vector<8x1xf32>, vector<8x1xf32> -> vector<8x16xf32>
    %149 = vector.extract_strided_slice %129 {offsets = [0, 19], sizes = [8, 13], strides = [1, 1]} : vector<8x32xf32> to vector<8x13xf32>
    %150 = vector.extract_strided_slice %129 {offsets = [0, 30], sizes = [8, 1], strides = [1, 1]} : vector<8x32xf32> to vector<8x1xf32>
    %151 = vector.extract_strided_slice %129 {offsets = [0, 29], sizes = [8, 1], strides = [1, 1]} : vector<8x32xf32> to vector<8x1xf32>
    %152 = vector.extract_strided_slice %129 {offsets = [0, 28], sizes = [8, 1], strides = [1, 1]} : vector<8x32xf32> to vector<8x1xf32>
    %153 = tpu.concatenate %149, %150, %151, %152 in 1 : vector<8x13xf32>, vector<8x1xf32>, vector<8x1xf32>, vector<8x1xf32> -> vector<8x16xf32>
    %154 = tpu.concatenate %148, %153 in 1 : vector<8x16xf32>, vector<8x16xf32> -> vector<8x32xf32>
    %155 = tpu.concatenate %140, %143, %154 in 0 : vector<8x32xf32>, vector<8x32xf32>, vector<8x32xf32> -> vector<24x32xf32>
    %c2 = arith.constant 2 : index
    %c0_41 = arith.constant 0 : index
    %c0_42 = arith.constant 0 : index
    %156 = vector.load %arg2[%c2, %c0_41, %c0_42] : memref<3x8x24xf32, #tpu.memory_space<vmem>>, vector<1x8x24xf32>
    %157 = vector.shape_cast %156 : vector<1x8x24xf32> to vector<8x24xf32>
    %cst_43 = arith.constant dense<0.000000e+00> : vector<8x32xf32>
    %158 = tpu.matmul %157, %155, %cst_43 {dimension_numbers = #tpu.dot_dimension_numbers<[1], [0], [0], [1], [0, 0, 1, 1], [], []>} : vector<8x24xf32>, vector<24x32xf32>, vector<8x32xf32> -> vector<8x32xf32>
    %c2_44 = arith.constant 2 : index
    %c0_45 = arith.constant 0 : index
    %c0_46 = arith.constant 0 : index
    %159 = vector.load %arg3[%c2_44, %c0_45, %c0_46] : memref<3x8x1xf32, #tpu.memory_space<vmem>>, vector<1x8x1xf32>
    %160 = vector.shape_cast %159 : vector<1x8x1xf32> to vector<8x1xf32>
    %161 = vector.broadcast %160 : vector<8x1xf32> to vector<8x32xf32>
    %162 = arith.addf %158, %161 : vector<8x32xf32>
    %cst_47 = arith.constant 0.000000e+00 : f32
    %163 = vector.broadcast %cst_47 : f32 to vector<8x32xf32>
    %164 = arith.maximumf %162, %163 : vector<8x32xf32>
    %cst_48 = arith.constant dense<0.000000e+00> : vector<8xf32>
    %165 = vector.multi_reduction <add>, %164, %cst_48 [1] : vector<8x32xf32> to vector<8xf32>
    %166 = vector.shape_cast %165 : vector<8xf32> to vector<8x1xf32>
    %cst_49 = arith.constant 3.125000e-02 : f32
    %167 = vector.broadcast %cst_49 : f32 to vector<8x1xf32>
    %168 = arith.mulf %166, %167 : vector<8x1xf32>
    %169 = vector.broadcast %168 : vector<8x1xf32> to vector<8x32xf32>
    %170 = arith.subf %164, %169 : vector<8x32xf32>
    %171 = arith.mulf %170, %170 : vector<8x32xf32>
    %cst_50 = arith.constant dense<0.000000e+00> : vector<8xf32>
    %172 = vector.multi_reduction <add>, %171, %cst_50 [1] : vector<8x32xf32> to vector<8xf32>
    %173 = vector.shape_cast %172 : vector<8xf32> to vector<8x1xf32>
    %cst_51 = arith.constant 3.125000e-02 : f32
    %174 = vector.broadcast %cst_51 : f32 to vector<8x1xf32>
    %175 = arith.mulf %173, %174 : vector<8x1xf32>
    %c2_52 = arith.constant 2 : index
    %c0_53 = arith.constant 0 : index
    %c0_54 = arith.constant 0 : index
    %176 = vector.load %arg4[%c2_52, %c0_53, %c0_54] : memref<3x8x1xf32, #tpu.memory_space<vmem>>, vector<1x8x1xf32>
    %177 = vector.shape_cast %176 : vector<1x8x1xf32> to vector<8x1xf32>
    %cst_55 = arith.constant 9.99999974E-6 : f32
    %178 = vector.broadcast %cst_55 : f32 to vector<8x1xf32>
    %179 = arith.addf %175, %178 : vector<8x1xf32>
    %180 = math.rsqrt %179 : vector<8x1xf32>
    %181 = arith.mulf %177, %180 : vector<8x1xf32>
    %c2_56 = arith.constant 2 : index
    %c0_57 = arith.constant 0 : index
    %c0_58 = arith.constant 0 : index
    %182 = vector.load %arg5[%c2_56, %c0_57, %c0_58] : memref<3x8x1xf32, #tpu.memory_space<vmem>>, vector<1x8x1xf32>
    %183 = vector.shape_cast %182 : vector<1x8x1xf32> to vector<8x1xf32>
    %184 = arith.mulf %168, %181 : vector<8x1xf32>
    %185 = arith.subf %183, %184 : vector<8x1xf32>
    %186 = vector.broadcast %181 : vector<8x1xf32> to vector<8x32xf32>
    %187 = arith.mulf %164, %186 : vector<8x32xf32>
    %188 = vector.broadcast %185 : vector<8x1xf32> to vector<8x32xf32>
    %189 = arith.addf %187, %188 : vector<8x32xf32>
    %c24 = arith.constant 24 : index
    %c0_59 = arith.constant 0 : index
    %190 = vector.load %arg6[%c24, %c0_59] : memref<32x32xf32, #tpu.memory_space<vmem>>, vector<8x32xf32>
    tpu.vector_store %arg6[%c24, %c0_59], %189 {strides = array<i32>} : memref<32x32xf32, #tpu.memory_space<vmem>>, vector<8x32xf32>,
    return
  }
  func.func @transform_0(%arg0: i32) -> (i32, i32) {
    %c0_i32 = arith.constant 0 : i32
    %c0_i32_0 = arith.constant 0 : i32
    %c0_i32_1 = arith.constant 0 : i32
    return %c0_i32, %c0_i32_0 : i32, i32
  }
  func.func @transform_1(%arg0: i32) -> (i32, i32, i32) {
    %c0_i32 = arith.constant 0 : i32
    %c0_i32_0 = arith.constant 0 : i32
    %c0_i32_1 = arith.constant 0 : i32
    %c0_i32_2 = arith.constant 0 : i32
    return %c0_i32, %c0_i32_0, %c0_i32_1 : i32, i32, i32
  }
  func.func @transform_2(%arg0: i32) -> (i32, i32, i32) {
    %c0_i32 = arith.constant 0 : i32
    %c0_i32_0 = arith.constant 0 : i32
    %c0_i32_1 = arith.constant 0 : i32
    %c0_i32_2 = arith.constant 0 : i32
    return %c0_i32, %c0_i32_0, %c0_i32_1 : i32, i32, i32
  }
  func.func @transform_3(%arg0: i32) -> (i32, i32, i32) {
    %c0_i32 = arith.constant 0 : i32
    %c0_i32_0 = arith.constant 0 : i32
    %c0_i32_1 = arith.constant 0 : i32
    %c0_i32_2 = arith.constant 0 : i32
    return %c0_i32, %c0_i32_0, %c0_i32_1 : i32, i32, i32
  }
  func.func @transform_4(%arg0: i32) -> (i32, i32, i32) {
    %c0_i32 = arith.constant 0 : i32
    %c0_i32_0 = arith.constant 0 : i32
    %c0_i32_1 = arith.constant 0 : i32
    %c0_i32_2 = arith.constant 0 : i32
    return %c0_i32, %c0_i32_0, %c0_i32_1 : i32, i32, i32
  }
  func.func @transform_5(%arg0: i32) -> (i32, i32) {
    %c0_i32 = arith.constant 0 : i32
    %c0_i32_0 = arith.constant 0 : i32
    %c0_i32_1 = arith.constant 0 : i32
    return %c0_i32, %c0_i32_0 : i32, i32
  }
}

</mosaic_0001>

<bundles_post_ra>
// kernel: res2net_block_pallas.1
= control target key start
LH: loop header
LB: loop body
LE: loop exit
PB: predicated region body
PF: predicated region fallthrough
CT: control target
= control target key end

     0   :  { %s592_s20 = smov 109   ;;  %s593_s21 = smov 113   ;;  %v600_v1 = vmov 0.0   ;;  %vm601_vm0 = vmmov 0   ;;  %vm39_vm1 = vcmask 7168   ;;  %vm66_vm2 = vcmask 105472   ;;  %s805_s0 = inlined_call_operand.vmem [shape: f32[32,32], index: 0, kind: input, shape index: {}]   ;;  %s806_s2 = inlined_call_operand.vmem [shape: f32[3,8,1], index: 2, kind: input, shape index: {}]   ;;  %s807_s1 = inlined_call_operand.vmem [shape: f32[3,8,24], index: 1, kind: input, shape index: {}]   ;;  %s808_s3 = inlined_call_operand.vmem [shape: f32[3,8,1], index: 3, kind: input, shape index: {}]   ;;  %s809_s4 = inlined_call_operand.vmem [shape: f32[3,8,1], index: 4, kind: input, shape index: {}]   ;;  %s810_s5 = inlined_call_operand.vmem [shape: f32[32,32], index: 5, kind: output, shape index: {}]  }
   0x1   :  { %v637_v0 = vld [vmem:[%s805_s0 + $0x8] sm:$0xff]  ;;  %s594_s22 = smov 111   ;;  %s595_s23 = smov 115   ;;  %545 = vmatprep.subr.mxu0 %v600_v1  ;;  %554 = vmatprep.subr.mxu1 %v600_v1  ;;  %v602_v4 = vmov 0   ;;  %vm68_vm3 = vcmask 113664   ;;  %vm41_vm4 = vcmask 15360  }
   0x2   :  { %45 = vrot.lane.b32.xlu0 %v637_v0, %s592_s20  ;;  %51 = vrot.lane.b32.xlu1 %v637_v0, %s593_s21  ;;  %s596_s24 = smov 125   ;;  %s597_s25 = smov 127   ;;  %vm70_vm5 = vcmask 121856   ;;  %vm43_vm6 = vcmask 23552   ;;  %v81_v13 = vld [vmem:[%s806_s2] sm:$0xff]  ;;  %vm64_vm7 = vcmask 130048  }
   0x3   :  { %s598_s26 = smov 1   ;;  %s599_s27 = smov 3   ;;  %551 = vmatprep.mubr.msk.f32.mxu0 %vm601_vm0, %v600_v1  ;;  %560 = vmatprep.mubr.msk.f32.mxu1 %vm601_vm0, %v600_v1  ;;  %v80_v27 = vld [vmem:[%s807_s1] sm:$0xff]  ;;  %vm87_vm8 = vcmask 195584   ;;  %vm24_vm9 = vcmask 261120   ;;  %v22_v52 = vld [vmem:[%s805_s0 + $0x10] sm:$0xff] }
   0x4   :  { %584 = vset.pattern.permute.xlu0 %v602_v4  ;;  %585 = vset.pattern.permute.xlu1 %v602_v4  ;;  %s603_s28 = smov 16   ;;  %v172_v43 = vld [vmem:[%s808_s3] sm:$0xff] }
   0x5   :  { %v176_v46 = vld [vmem:[%s809_s4] sm:$0xff] }
   0x6   :  { %48 = vrot.lane.b32.xlu0 %v637_v0, %s594_s22  ;;  %54 = vrot.lane.b32.xlu1 %v637_v0, %s595_s23  ;;  %v20_v47 = vld [vmem:[%s805_s0] sm:$0xff] }
   0x7   :  { %25 = vst.msk [vmem:[%s810_s5] sm:$0xff] %vm24_vm9, %v20_v47 }
   0xa   :  { %27 = vrot.lane.b32.xlu0 %v637_v0, %s596_s24  ;;  %30 = vrot.lane.b32.xlu1 %v637_v0, %s597_s25 }
   0xe   :  { %33 = vrot.lane.b32.xlu0 %v637_v0, %s598_s26  ;;  %36 = vrot.lane.b32.xlu1 %v637_v0, %s599_s27 }
  0x74   :  { %v46_v2 = vpop.permute.xlu0 %45  ;;  %v52_v3 = vpop.permute.xlu1 %51 }
  0x78   :  { %v49_v5 = vpop.permute.xlu0 %48  ;;  %v55_v6 = vpop.permute.xlu1 %54 }
  0x79   :  { %v57_v7 = vsel %vm39_vm1, %v46_v2, %v49_v5  ;;  %v72_v8 = vsel %vm66_vm2, %v46_v2, %v49_v5 }
  0x7a   :  { %v73_v9 = vsel %vm68_vm3, %v72_v8, %v52_v3  ;;  %v58_v10 = vsel %vm41_vm4, %v57_v7, %v52_v3  ;;  %v524_v3 = vld [vmem:[%s806_s2 + $0x8] sm:$0xff] }
  0x7b   :  { %v74_v11 = vsel %vm70_vm5, %v73_v9, %v55_v6  ;;  %v59_v12 = vsel %vm43_vm6, %v58_v10, %v55_v6 }
  0x7c   :  { %76 = vrot.lane.b32.xlu0 %v74_v11, %s603_s28  ;;  %61 = vrot.lane.b32.xlu1 %v59_v12, %s603_s28  ;;  %v28_v14 = vpop.permute.xlu0 %27  ;;  %v31_v15 = vpop.permute.xlu1 %30 }
  0x7d   :  { %v67_v16 = vsel %vm66_vm2, %v28_v14, %v31_v15  ;;  %v40_v20 = vsel %vm39_vm1, %v28_v14, %v31_v15 }
  0x80   :  { %84 = vperm.xlu0 %584, %v81_v13   ;;  %v34_v17 = vpop.permute.xlu0 %33  ;;  %v37_v19 = vpop.permute.xlu1 %36 }
  0x81   :  { %v69_v18 = vsel %vm68_vm3, %v67_v16, %v34_v17  ;;  %v42_v23 = vsel %vm41_vm4, %v40_v20, %v34_v17  ;;  %v523_v17 = vld [vmem:[%s807_s1 + $0x8] sm:$0xff] }
  0x82   :  { %v71_v21 = vsel %vm70_vm5, %v69_v18, %v37_v19  ;;  %v44_v26 = vsel %vm43_vm6, %v42_v23, %v37_v19 }
  0xee   :  { %v77_v22 = vpop.permute.xlu0 %76  ;;  %v62_v25 = vpop.permute.xlu1 %61 }
  0xef   :  { %v79_v24 = vsel %vm64_vm7, %v71_v21, %v77_v22  ;;  %v65_v28 = vsel %vm64_vm7, %v44_v26, %v62_v25 }
  0xf0   :  { %546 = vmatpush3.msra.mxu0 %v79_v24 }
  0xf1   :  { %547 = vmatprep.subr.mxu0 %v600_v1 }
  0xf2   :  { %548 = vmatpush3.msra.mxu0 %v637_v0 }
  0xf3   :  { %549 = vmatprep.subr.mxu0 %v600_v1 }
  0xf4   :  { %550 = vmatpush3.msra.mxu0 %v65_v28 }
  0xf5   :  { %552 = vmatmul.mubr.msk.f32.vlgmr.msra.gmra.mxu0 %vm87_vm8, %v80_v27  ;;  %563 = vmatprep.subr.mxu0 %v600_v1 }
  0xf6   :  { %569 = vmatprep.mubr.msk.f32.mxu0 %vm601_vm0, %v600_v1 }
  0xfb   :  { %v85_v29 = vpop.permute.xlu0 %84 }
 0x1b5   :  { %v157_v30 = vpop.f32.mrf.mxu0 }
 0x1b6   :  { %v158_v31 = vadd.f32 %v157_v30, %v85_v29 }
 0x1b7   :  { %v553_v32 = vpop.f32.mrf.mxu0 }
 0x1b8   :  { %v161_v33 = vmax.f32 %v158_v31, 0.0 }
 0x1ba   :  { %v162_v34 = vsel %vm24_vm9, %v161_v33, 0.0 }
 0x1bb   :  { %163 = vadd.xlane.f32.xlu1 %v162_v34 }
 0x244   :  { %v164_v35 = vpop.xlane.xlu1 %163 }
 0x245   :  { %v165_v36 = vmul.f32 0.03125, %v164_v35 }
 0x247   :  { %v166_v37 = vsub.f32 %v161_v33, %v165_v36 }
 0x249   :  { %v167_v38 = vmul.f32 %v166_v37, %v166_v37 }
 0x24b   :  { %v168_v39 = vsel %vm24_vm9, %v167_v38, 0.0 }
 0x24c   :  { %169 = vadd.xlane.f32.xlu0 %v168_v39 }
 0x2d5   :  { %v170_v40 = vpop.xlane.xlu0 %169 }
 0x2d6   :  { %v171_v41 = vmul.f32 0.03125, %v170_v40 }
 0x2d8   :  { %v173_v42 = vadd.f32 1e-05, %v171_v41  ;;  %v23_v41 = vld [vmem:[%s805_s0 + $0x18] sm:$0xff] }
 0x2da   :  { %586 = vrsqrt.f32 %v173_v42 }
 0x2e7   :  { %v587_v44 = vpop.eup %586 }
 0x2e8   :  { %v175_v45 = vmul.f32 %v587_v44, %v172_v43 }
 0x2ea   :  { %181 = vperm.xlu1 %585, %v175_v45   ;;  %v177_v48 = vmul.f32 %v175_v45, %v165_v36  ;;  %v527_v36 = vld [vmem:[%s809_s4 + $0x8] sm:$0xff] }
 0x2ec   :  { %v178_v49 = vsub.f32 %v176_v46, %v177_v48 }
 0x2ee   :  { %187 = vperm.xlu0 %584, %v178_v49  }
 0x365   :  { %v182_v50 = vpop.permute.xlu1 %181 }
 0x366   :  { %v184_v51 = vmul.f32 %v182_v50, %v161_v33  ;;  %v526_v33 = vld [vmem:[%s808_s3 + $0x8] sm:$0xff] }
 0x369   :  { %v188_v53 = vpop.permute.xlu0 %187 }
 0x36a   :  { %v190_v54 = vadd.f32 %v188_v53, %v184_v51 }
 0x36c   :  { %191 = vst.msk [vmem:[%s810_s5 + $0x8] sm:$0xff] %vm24_vm9, %v190_v54  ;;  %v192_v55 = vadd.f32 %v190_v54, %v22_v52 }
 0x36e   :  { %215 = vrot.lane.b32.xlu0 %v192_v55, %s593_s21  ;;  %209 = vrot.lane.b32.xlu1 %v192_v55, %s592_s20 }
 0x372   :  { %194 = vrot.lane.b32.xlu0 %v192_v55, %s596_s24  ;;  %212 = vrot.lane.b32.xlu1 %v192_v55, %s594_s22 }
 0x376   :  { %200 = vrot.lane.b32.xlu0 %v192_v55, %s598_s26  ;;  %218 = vrot.lane.b32.xlu1 %v192_v55, %s595_s23 }
 0x37a   :  { %197 = vrot.lane.b32.xlu1 %v192_v55, %s597_s25 }
 0x37e   :  { %203 = vrot.lane.b32.xlu1 %v192_v55, %s599_s27 }
 0x3e0   :  { %v210_v56 = vpop.permute.xlu1 %209  ;;  %v216_v60 = vpop.permute.xlu0 %215 }
 0x3e4   :  { %v213_v57 = vpop.permute.xlu1 %212  ;;  %v195_v4 = vpop.permute.xlu0 %194 }
 0x3e5   :  { %v221_v58 = vsel %vm39_vm1, %v210_v56, %v213_v57  ;;  %v232_v59 = vsel %vm66_vm2, %v210_v56, %v213_v57 }
 0x3e6   :  { %v233_v62 = vsel %vm68_vm3, %v232_v59, %v216_v60  ;;  %v222_v63 = vsel %vm41_vm4, %v221_v58, %v216_v60 }
 0x3e8   :  { %v219_v61 = vpop.permute.xlu1 %218  ;;  %v201_v6 = vpop.permute.xlu0 %200 }
 0x3e9   :  { %v234_v0 = vsel %vm70_vm5, %v233_v62, %v219_v61  ;;  %v223_v2 = vsel %vm43_vm6, %v222_v63, %v219_v61 }
 0x3ea   :  { %236 = vrot.lane.b32.xlu0 %v234_v0, %s603_s28  ;;  %225 = vrot.lane.b32.xlu1 %v223_v2, %s603_s28 }
 0x3ec   :  { %v198_v5 = vpop.permute.xlu1 %197 }
 0x3ed   :  { %v229_v7 = vsel %vm66_vm2, %v195_v4, %v198_v5  ;;  %v206_v10 = vsel %vm39_vm1, %v195_v4, %v198_v5 }
 0x3ee   :  { %246 = vperm.xlu0 %584, %v524_v3   ;;  %v230_v9 = vsel %vm68_vm3, %v229_v7, %v201_v6  ;;  %v207_v15 = vsel %vm41_vm4, %v206_v10, %v201_v6  ;;  %v528_v6 = vld [vmem:[%s807_s1 + $0x10] sm:$0xff] }
 0x3f0   :  { %v204_v8 = vpop.permute.xlu1 %203 }
 0x3f1   :  { %v231_v11 = vsel %vm70_vm5, %v230_v9, %v204_v8  ;;  %v208_v16 = vsel %vm43_vm6, %v207_v15, %v204_v8 }
 0x45c   :  { %v237_v12 = vpop.permute.xlu0 %236  ;;  %v226_v14 = vpop.permute.xlu1 %225 }
 0x45d   :  { %v239_v13 = vsel %vm64_vm7, %v231_v11, %v237_v12  ;;  %v228_v18 = vsel %vm64_vm7, %v208_v16, %v226_v14 }
 0x45e   :  { %555 = vmatpush3.msra.mxu1 %v239_v13 }
 0x45f   :  { %556 = vmatprep.subr.mxu1 %v600_v1 }
 0x460   :  { %557 = vmatpush3.msra.mxu1 %v192_v55  ;;  %v529_v55 = vld [vmem:[%s806_s2 + $0x10] sm:$0xff] }
 0x461   :  { %558 = vmatprep.subr.mxu1 %v600_v1 }
 0x462   :  { %559 = vmatpush3.msra.mxu1 %v228_v18 }
 0x463   :  { %561 = vmatmul.mubr.msk.f32.vlgmr.msra.gmra.mxu1 %vm87_vm8, %v523_v17 }
 0x469   :  { %v247_v19 = vpop.permute.xlu0 %246 }
 0x523   :  { %v318_v20 = vpop.f32.mrf.mxu1 }
 0x524   :  { %v319_v21 = vadd.f32 %v318_v20, %v247_v19 }
 0x525   :  { %v562_v22 = vpop.f32.mrf.mxu1 }
 0x526   :  { %v322_v23 = vmax.f32 %v319_v21, 0.0  ;;  %v531_v21 = vld [vmem:[%s808_s3 + $0x10] sm:$0xff] }
 0x528   :  { %v323_v24 = vsel %vm24_vm9, %v322_v23, 0.0 }
 0x529   :  { %324 = vadd.xlane.f32.xlu1 %v323_v24  ;;  %v532_v24 = vld [vmem:[%s809_s4 + $0x10] sm:$0xff] }
 0x5b2   :  { %v325_v25 = vpop.xlane.xlu1 %324 }
 0x5b3   :  { %v326_v26 = vmul.f32 0.03125, %v325_v25 }
 0x5b5   :  { %v327_v27 = vsub.f32 %v322_v23, %v326_v26 }
 0x5b7   :  { %v328_v28 = vmul.f32 %v327_v27, %v327_v27 }
 0x5b9   :  { %v329_v29 = vsel %vm24_vm9, %v328_v28, 0.0 }
 0x5ba   :  { %330 = vadd.xlane.f32.xlu0 %v329_v29 }
 0x643   :  { %v331_v30 = vpop.xlane.xlu0 %330 }
 0x644   :  { %v332_v31 = vmul.f32 0.03125, %v331_v30 }
 0x646   :  { %v335_v32 = vadd.f32 1e-05, %v332_v31 }
 0x648   :  { %588 = vrsqrt.f32 %v335_v32 }
 0x655   :  { %v589_v34 = vpop.eup %588 }
 0x656   :  { %v337_v35 = vmul.f32 %v589_v34, %v526_v33 }
 0x658   :  { %344 = vperm.xlu0 %584, %v337_v35   ;;  %v340_v37 = vmul.f32 %v337_v35, %v326_v26 }
 0x65a   :  { %v341_v38 = vsub.f32 %v527_v36, %v340_v37 }
 0x65c   :  { %350 = vperm.xlu1 %585, %v341_v38  }
 0x6d3   :  { %v345_v39 = vpop.permute.xlu0 %344 }
 0x6d4   :  { %v347_v40 = vmul.f32 %v345_v39, %v322_v23 }
 0x6d7   :  { %v351_v42 = vpop.permute.xlu1 %350 }
 0x6d8   :  { %v353_v43 = vadd.f32 %v351_v42, %v347_v40 }
 0x6da   :  { %354 = vst.msk [vmem:[%s810_s5 + $0x10] sm:$0xff] %vm24_vm9, %v353_v43  ;;  %v355_v44 = vadd.f32 %v353_v43, %v23_v41 }
 0x6dc   :  { %375 = vrot.lane.b32.xlu0 %v355_v44, %s594_s22  ;;  %372 = vrot.lane.b32.xlu1 %v355_v44, %s592_s20 }
 0x6e0   :  { %381 = vrot.lane.b32.xlu0 %v355_v44, %s595_s23  ;;  %378 = vrot.lane.b32.xlu1 %v355_v44, %s593_s21 }
 0x6e4   :  { %360 = vrot.lane.b32.xlu0 %v355_v44, %s597_s25  ;;  %357 = vrot.lane.b32.xlu1 %v355_v44, %s596_s24 }
 0x6e8   :  { %366 = vrot.lane.b32.xlu0 %v355_v44, %s599_s27  ;;  %363 = vrot.lane.b32.xlu1 %v355_v44, %s598_s26 }
 0x74e   :  { %v376_v45 = vpop.permute.xlu0 %375  ;;  %v373_v46 = vpop.permute.xlu1 %372 }
 0x74f   :  { %v384_v47 = vsel %vm39_vm1, %v373_v46, %v376_v45  ;;  %v395_v48 = vsel %vm66_vm2, %v373_v46, %v376_v45 }
 0x752   :  { %v382_v49 = vpop.permute.xlu0 %381  ;;  %v379_v50 = vpop.permute.xlu1 %378 }
 0x753   :  { %v385_v51 = vsel %vm41_vm4, %v384_v47, %v379_v50  ;;  %v396_v52 = vsel %vm68_vm3, %v395_v48, %v379_v50 }
 0x754   :  { %v397_v53 = vsel %vm70_vm5, %v396_v52, %v382_v49  ;;  %v386_v54 = vsel %vm43_vm6, %v385_v51, %v382_v49 }
 0x755   :  { %399 = vrot.lane.b32.xlu1 %v397_v53, %s603_s28  ;;  %388 = vrot.lane.b32.xlu0 %v386_v54, %s603_s28 }
 0x756   :  { %v358_v56 = vpop.permute.xlu1 %357  ;;  %v361_v57 = vpop.permute.xlu0 %360 }
 0x757   :  { %v392_v59 = vsel %vm66_vm2, %v358_v56, %v361_v57  ;;  %v369_v62 = vsel %vm39_vm1, %v358_v56, %v361_v57 }
 0x759   :  { %409 = vperm.xlu1 %585, %v529_v55  }
 0x75a   :  { %v364_v58 = vpop.permute.xlu1 %363  ;;  %v367_v60 = vpop.permute.xlu0 %366 }
 0x75b   :  { %v393_v61 = vsel %vm68_vm3, %v392_v59, %v364_v58  ;;  %v370_v2 = vsel %vm41_vm4, %v369_v62, %v364_v58 }
 0x75c   :  { %v394_v63 = vsel %vm70_vm5, %v393_v61, %v367_v60  ;;  %v371_v5 = vsel %vm43_vm6, %v370_v2, %v367_v60 }
 0x7c7   :  { %v400_v0 = vpop.permute.xlu1 %399  ;;  %v389_v4 = vpop.permute.xlu0 %388 }
 0x7c8   :  { %v402_v3 = vsel %vm64_vm7, %v394_v63, %v400_v0  ;;  %v391_v7 = vsel %vm64_vm7, %v371_v5, %v389_v4 }
 0x7c9   :  { %564 = vmatpush3.msra.mxu0 %v402_v3 }
 0x7ca   :  { %565 = vmatprep.subr.mxu0 %v600_v1 }
 0x7cb   :  { %566 = vmatpush3.msra.mxu0 %v355_v44 }
 0x7cc   :  { %567 = vmatprep.subr.mxu0 %v600_v1 }
 0x7cd   :  { %568 = vmatpush3.msra.mxu0 %v391_v7 }
 0x7ce   :  { %570 = vmatmul.mubr.msk.f32.vlgmr.msra.gmra.mxu0 %vm87_vm8, %v528_v6 }
 0x7d4   :  { %v410_v8 = vpop.permute.xlu1 %409 }
 0x88e   :  { %v481_v9 = vpop.f32.mrf.mxu0 }
 0x88f   :  { %v482_v10 = vadd.f32 %v481_v9, %v410_v8 }
 0x890   :  { %v571_v11 = vpop.f32.mrf.mxu0 }
 0x891   :  { %v485_v12 = vmax.f32 %v482_v10, 0.0 }
 0x893   :  { %v486_v13 = vsel %vm24_vm9, %v485_v12, 0.0 }
 0x894   :  { %487 = vadd.xlane.f32.xlu0 %v486_v13 }
 0x91d   :  { %v488_v14 = vpop.xlane.xlu0 %487 }
 0x91e   :  { %v489_v15 = vmul.f32 0.03125, %v488_v14 }
 0x920   :  { %v490_v16 = vsub.f32 %v485_v12, %v489_v15 }
 0x922   :  { %v491_v17 = vmul.f32 %v490_v16, %v490_v16 }
 0x924   :  { %v492_v18 = vsel %vm24_vm9, %v491_v17, 0.0 }
 0x925   :  { %493 = vadd.xlane.f32.xlu1 %v492_v18 }
 0x9ae   :  { %v494_v19 = vpop.xlane.xlu1 %493 }
 0x9af   :  { %v495_v1 = vmul.f32 0.03125, %v494_v19 }
 0x9b1   :  { %v498_v20 = vadd.f32 1e-05, %v495_v1 }
 0x9b3   :  { %590 = vrsqrt.f32 %v498_v20 }
 0x9c0   :  { %v591_v22 = vpop.eup %590 }
 0x9c1   :  { %v500_v23 = vmul.f32 %v591_v22, %v531_v21 }
 0x9c3   :  { %507 = vperm.xlu0 %584, %v500_v23   ;;  %v503_v25 = vmul.f32 %v500_v23, %v489_v15 }
 0x9c5   :  { %v504_v26 = vsub.f32 %v532_v24, %v503_v25 }
 0x9c7   :  { %513 = vperm.xlu1 %585, %v504_v26  }
 0xa3e   :  { %v508_v27 = vpop.permute.xlu0 %507 }
 0xa3f   :  { %v510_v28 = vmul.f32 %v508_v27, %v485_v12 }
 0xa42   :  { %v514_v29 = vpop.permute.xlu1 %513 }
 0xa43   :  { %v516_v30 = vadd.f32 %v514_v29, %v510_v28 }
 0xa45   :  { %517 = vst.msk [vmem:[%s810_s5 + $0x18] sm:$0xff] %vm24_vm9, %v516_v30 }

</bundles_post_ra>
